<compile_context>
chip_gen: v7x
topology: tpu7x:2x2x1
jax: 0.10.0
libtpu: 0.0.40
codegen_flags: <defaults>
</compile_context>

<pallas_src>
import functools
import math

import jax
import jax.numpy as jnp
import numpy as np
from jax import lax
from jax.experimental import pallas as pl
from jax.experimental.pallas import tpu as pltpu


def _attention_kernel(q_ref, k_ref, v_ref,
                      wqT_ref, wkT_ref, wvT_ref,
                      bq_ref, bk_ref, bv_ref,
                      bias_ref, o_ref, *, scale):
    # q_ref/k_ref/v_ref: (T*B, E) flattened activations -> one big matmul per projection.
    # wxT_ref: (E, E) pre-transposed weights so x @ W.T == x @ wxT.  bx_ref: (1, E).
    q = jnp.dot(q_ref[...], wqT_ref[...], preferred_element_type=jnp.float32) + bq_ref[...]
    k = jnp.dot(k_ref[...], wkT_ref[...], preferred_element_type=jnp.float32) + bk_ref[...]
    v = jnp.dot(v_ref[...], wvT_ref[...], preferred_element_type=jnp.float32) + bv_ref[...]

    # q @ k^T without materializing k.T: contract dim 1 of q against dim 1 of k.
    scores = lax.dot_general(q, k, (((1,), (1,)), ((), ())),
                             preferred_element_type=jnp.float32)
    # Block-diagonal additive bias: 0 within a time step, -1e30 across time steps, so
    # the flattened softmax is exactly the reference per-time-step softmax.
    scores = scores * scale + bias_ref[...]

    # TODO(synk): optional `mask` argument (masked_fill(mask == 0, -1e-09)) not wired
    # through; this implements the module's default mask=None path.

    # numerically stable softmax along the last axis (matches F.softmax)
    m = jnp.max(scores, axis=-1, keepdims=True)
    p = jnp.exp(scores - m)
    probs = p / jnp.sum(p, axis=-1, keepdims=True)

    # dropout_p = 0.0 -> identity
    o_ref[...] = jnp.dot(probs, v, preferred_element_type=jnp.float32).astype(o_ref.dtype)


def basic_attention(key, value, query, wq, wk, wv, bq, bk, bv):
    """key/value/query: (T, B, E); weights: (E, E) torch Linear layout; biases: (E,)."""
    T, B, E = query.shape
    TB = T * B
    scale = float(E) ** (-0.5)

    # Glue (free, row-major contiguous reshapes / transposes done once in XLA):
    q2 = query.reshape(TB, E)
    k2 = key.reshape(TB, E)
    v2 = value.reshape(TB, E)
    wqT, wkT, wvT = wq.T, wk.T, wv.T
    bq2, bk2, bv2 = bq.reshape(1, E), bk.reshape(1, E), bv.reshape(1, E)

    # Constant block-diagonal additive bias restricting attention to the same time step.
    t_ids = np.arange(TB) // B
    attn_bias = jnp.asarray(
        np.where(t_ids[:, None] == t_ids[None, :], 0.0, -1e30), dtype=jnp.float32)

    kernel = functools.partial(_attention_kernel, scale=scale)

    # Advisory cost hint for XLA scheduling around the custom call.
    flops = 2 * (3 * TB * E * E + 2 * TB * TB * E)
    bytes_accessed = 4 * (3 * TB * E + 3 * E * E + 3 * E + TB * TB + TB * E)
    cost = pl.CostEstimate(flops=flops, transcendentals=TB * TB,
                           bytes_accessed=bytes_accessed)

    def vmem_spec():
        return pl.BlockSpec(memory_space=pltpu.MemorySpace.VMEM)

    out2 = pl.pallas_call(
        kernel,
        out_shape=jax.ShapeDtypeStruct((TB, E), query.dtype),
        in_specs=[vmem_spec() for _ in range(10)],
        out_specs=vmem_spec(),
        cost_estimate=cost,
    )(q2, k2, v2, wqT, wkT, wvT, bq2, bk2, bv2, attn_bias)

    return out2.reshape(T, B, E)


def _reference(key, value, query, wq, wk, wv, bq, bk, bv):
    E = query.shape[-1]
    q = query @ wq.T + bq
    k = key @ wk.T + bk
    v = value @ wv.T + bv
    scores = jnp.einsum("tbe,tce->tbc", q, k) * (float(E) ** -0.5)
    probs = jax.nn.softmax(scores, axis=-1)
    return jnp.einsum("tbc,tce->tbe", probs, v)


if __name__ == "__main__":
    T, B, E = 8, 4, 32   # (time, batch, embed)

    root = jax.random.PRNGKey(0)
    kq, kk, kv, kwq, kwk, kwv, kbq, kbk, kbv = jax.random.split(root, 9)

    query = jax.random.normal(kq, (T, B, E), jnp.float32)
    key = jax.random.normal(kk, (T, B, E), jnp.float32)
    value = jax.random.normal(kv, (T, B, E), jnp.float32)

    # xavier_uniform_ for (E, E) weights: bound = sqrt(6 / (fan_in + fan_out))
    bound = math.sqrt(6.0 / (E + E))
    wq = jax.random.uniform(kwq, (E, E), jnp.float32, -bound, bound)
    wk = jax.random.uniform(kwk, (E, E), jnp.float32, -bound, bound)
    wv = jax.random.uniform(kwv, (E, E), jnp.float32, -bound, bound)

    # xavier_normal_ on the (1, E)-reshaped biases: std = sqrt(2 / (1 + E))
    bstd = math.sqrt(2.0 / (1 + E))
    bq = bstd * jax.random.normal(kbq, (E,), jnp.float32)
    bk = bstd * jax.random.normal(kbk, (E,), jnp.float32)
    bv = bstd * jax.random.normal(kbv, (E,), jnp.float32)

    out = basic_attention(key, value, query, wq, wk, wv, bq, bk, bv)
    out = jax.block_until_ready(out)

    ref = _reference(key, value, query, wq, wk, wv, bq, bk, bv)
    np.testing.assert_allclose(np.asarray(out), np.asarray(ref), rtol=1e-5, atol=1e-5)

    print("KERNEL_OK")
</pallas_src>

<mosaic_0001>
module attributes {stable_mosaic.version = 11 : i64} {
  func.func @_attention_kernel(%arg0: memref<32x32xf32, #tpu.memory_space<vmem>>, %arg1: memref<32x32xf32, #tpu.memory_space<vmem>>, %arg2: memref<32x32xf32, #tpu.memory_space<vmem>>, %arg3: memref<32x32xf32, #tpu.memory_space<vmem>>, %arg4: memref<32x32xf32, #tpu.memory_space<vmem>>, %arg5: memref<32x32xf32, #tpu.memory_space<vmem>>, %arg6: memref<1x32xf32, #tpu.memory_space<vmem>>, %arg7: memref<1x32xf32, #tpu.memory_space<vmem>>, %arg8: memref<1x32xf32, #tpu.memory_space<vmem>>, %arg9: memref<32x32xf32, #tpu.memory_space<vmem>>, %arg10: memref<32x32xf32, #tpu.memory_space<vmem>>) attributes {dimension_semantics = [], scalar_prefetch = 0 : i64, scratch_operands = 0 : i64, tpu.core_type = #tpu.core_type<tc>} {
    %c0 = arith.constant 0 : index
    %c0_0 = arith.constant 0 : index
    %0 = vector.load %arg0[%c0, %c0_0] : memref<32x32xf32, #tpu.memory_space<vmem>>, vector<32x32xf32>
    %c0_1 = arith.constant 0 : index
    %c0_2 = arith.constant 0 : index
    %1 = vector.load %arg3[%c0_1, %c0_2] : memref<32x32xf32, #tpu.memory_space<vmem>>, vector<32x32xf32>
    %cst = arith.constant dense<0.000000e+00> : vector<32x32xf32>
    %2 = tpu.matmul %0, %1, %cst {dimension_numbers = #tpu.dot_dimension_numbers<[1], [0], [0], [1], [0, 0, 1, 1], [], []>} : vector<32x32xf32>, vector<32x32xf32>, vector<32x32xf32> -> vector<32x32xf32>
    %c0_3 = arith.constant 0 : index
    %c0_4 = arith.constant 0 : index
    %3 = vector.load %arg6[%c0_3, %c0_4] : memref<1x32xf32, #tpu.memory_space<vmem>>, vector<1x32xf32>
    %4 = vector.broadcast %3 : vector<1x32xf32> to vector<32x32xf32>
    %5 = arith.addf %2, %4 : vector<32x32xf32>
    %c0_5 = arith.constant 0 : index
    %c0_6 = arith.constant 0 : index
    %6 = vector.load %arg1[%c0_5, %c0_6] : memref<32x32xf32, #tpu.memory_space<vmem>>, vector<32x32xf32>
    %c0_7 = arith.constant 0 : index
    %c0_8 = arith.constant 0 : index
    %7 = vector.load %arg4[%c0_7, %c0_8] : memref<32x32xf32, #tpu.memory_space<vmem>>, vector<32x32xf32>
    %cst_9 = arith.constant dense<0.000000e+00> : vector<32x32xf32>
    %8 = tpu.matmul %6, %7, %cst_9 {dimension_numbers = #tpu.dot_dimension_numbers<[1], [0], [0], [1], [0, 0, 1, 1], [], []>} : vector<32x32xf32>, vector<32x32xf32>, vector<32x32xf32> -> vector<32x32xf32>
    %c0_10 = arith.constant 0 : index
    %c0_11 = arith.constant 0 : index
    %9 = vector.load %arg7[%c0_10, %c0_11] : memref<1x32xf32, #tpu.memory_space<vmem>>, vector<1x32xf32>
    %10 = vector.broadcast %9 : vector<1x32xf32> to vector<32x32xf32>
    %11 = arith.addf %8, %10 : vector<32x32xf32>
    %c0_12 = arith.constant 0 : index
    %c0_13 = arith.constant 0 : index
    %12 = vector.load %arg2[%c0_12, %c0_13] : memref<32x32xf32, #tpu.memory_space<vmem>>, vector<32x32xf32>
    %c0_14 = arith.constant 0 : index
    %c0_15 = arith.constant 0 : index
    %13 = vector.load %arg5[%c0_14, %c0_15] : memref<32x32xf32, #tpu.memory_space<vmem>>, vector<32x32xf32>
    %cst_16 = arith.constant dense<0.000000e+00> : vector<32x32xf32>
    %14 = tpu.matmul %12, %13, %cst_16 {dimension_numbers = #tpu.dot_dimension_numbers<[1], [0], [0], [1], [0, 0, 1, 1], [], []>} : vector<32x32xf32>, vector<32x32xf32>, vector<32x32xf32> -> vector<32x32xf32>
    %c0_17 = arith.constant 0 : index
    %c0_18 = arith.constant 0 : index
    %15 = vector.load %arg8[%c0_17, %c0_18] : memref<1x32xf32, #tpu.memory_space<vmem>>, vector<1x32xf32>
    %16 = vector.broadcast %15 : vector<1x32xf32> to vector<32x32xf32>
    %17 = arith.addf %14, %16 : vector<32x32xf32>
    %cst_19 = arith.constant dense<0.000000e+00> : vector<32x32xf32>
    %18 = tpu.matmul %5, %11, %cst_19 {dimension_numbers = #tpu.dot_dimension_numbers<[1], [1], [0], [0], [0, 0, 1, 0], [], []>} : vector<32x32xf32>, vector<32x32xf32>, vector<32x32xf32> -> vector<32x32xf32>
    %cst_20 = arith.constant 0.176776692 : f32
    %19 = vector.broadcast %cst_20 : f32 to vector<32x32xf32>
    %20 = arith.mulf %18, %19 : vector<32x32xf32>
    %c0_21 = arith.constant 0 : index
    %c0_22 = arith.constant 0 : index
    %21 = vector.load %arg9[%c0_21, %c0_22] : memref<32x32xf32, #tpu.memory_space<vmem>>, vector<32x32xf32>
    %22 = arith.addf %20, %21 : vector<32x32xf32>
    %cst_23 = arith.constant dense<0xFF800000> : vector<32xf32>
    %23 = vector.multi_reduction <maximumf>, %22, %cst_23 [1] : vector<32x32xf32> to vector<32xf32>
    %24 = vector.shape_cast %23 : vector<32xf32> to vector<32x1xf32>
    %25 = vector.broadcast %24 : vector<32x1xf32> to vector<32x32xf32>
    %26 = arith.subf %22, %25 : vector<32x32xf32>
    %27 = math.exp %26 : vector<32x32xf32>
    %cst_24 = arith.constant dense<0.000000e+00> : vector<32xf32>
    %28 = vector.multi_reduction <add>, %27, %cst_24 [1] : vector<32x32xf32> to vector<32xf32>
    %29 = vector.shape_cast %28 : vector<32xf32> to vector<32x1xf32>
    %30 = vector.broadcast %29 : vector<32x1xf32> to vector<32x32xf32>
    %31 = arith.divf %27, %30 : vector<32x32xf32>
    %cst_25 = arith.constant dense<0.000000e+00> : vector<32x32xf32>
    %32 = tpu.matmul %31, %17, %cst_25 {dimension_numbers = #tpu.dot_dimension_numbers<[1], [0], [0], [1], [0, 0, 1, 1], [], []>} : vector<32x32xf32>, vector<32x32xf32>, vector<32x32xf32> -> vector<32x32xf32>
    %c0_26 = arith.constant 0 : index
    %c0_27 = arith.constant 0 : index
    %33 = vector.load %arg10[%c0_26, %c0_27] : memref<32x32xf32, #tpu.memory_space<vmem>>, vector<32x32xf32>
    tpu.vector_store %arg10[%c0_26, %c0_27], %32 {strides = array<i32>} : memref<32x32xf32, #tpu.memory_space<vmem>>, vector<32x32xf32>,
    return
  }
}

</mosaic_0001>

<bundles_post_ra>
// kernel: tpu_custom_call.1
= control target key start
LH: loop header
LB: loop body
LE: loop exit
PB: predicated region body
PF: predicated region fallthrough
CT: control target
= control target key end

     0   :  { %15 = vsyncpa [#allocation3], 0  ;;  %s1412_s0 = inlined_call_operand.hbm [shape: f32[32,32], index: 0, kind: input, shape index: {}]   ;;  %s1413_s1 = inlined_call_operand.hbm [shape: f32[32,32], index: 1, kind: input, shape index: {}]   ;;  %s1414_s2 = inlined_call_operand.hbm [shape: f32[32,32], index: 2, kind: input, shape index: {}]   ;;  %s1415_s3 = inlined_call_operand.hbm [shape: f32[32,32], index: 3, kind: input, shape index: {}]   ;;  %s1416_s4 = inlined_call_operand.hbm [shape: f32[32,32], index: 4, kind: input, shape index: {}]   ;;  %s1417_s5 = inlined_call_operand.hbm [shape: f32[32,32], index: 5, kind: input, shape index: {}]   ;;  %s1418_s6 = inlined_call_operand.vmem [shape: f32[1,32], index: 6, kind: input, shape index: {}]   ;;  %s1419_s7 = inlined_call_operand.vmem [shape: f32[1,32], index: 7, kind: input, shape index: {}]   ;;  %s1420_s8 = inlined_call_operand.hbm [shape: f32[1,32], index: 8, kind: input, shape index: {}]   ;;  %s1421_s9 = inlined_call_operand.vmem [shape: f32[32,32], index: 9, kind: input, shape index: {}]   ;;  %s1422_s10 = inlined_call_operand.hbm [shape: f32[32,32], index: 10, kind: output, shape index: {}]  }
   0x1   :  { %16 = vsyncpa [#allocation6], 0 }
   0x2   :  { %17 = vsyncpa [#allocation9], 0 }
   0x3   :  { %18 = vsyncpa [#allocation12], 0 }
   0x4   :  { %19 = vsyncpa [#allocation4], 0  ;;  %s1145_s13 = smov [#allocation5]   ;;  %s1146_s15 = smov [#allocation8]  }
   0x5   :  { %s37_s14 = sshll.u32 %s1145_s13, 4  ;;  %s61_s16 = sshll.u32 %s1146_s15, 4  ;;  %s38_s14 = int_to_ptr.vmem [resolvable:$true] %s37_s14  ;;  %s1210_s16 = int_to_ptr.vmem [resolvable:$true] %s61_s16 }
   0x6   :  { %s959_s19 = scalar_lea.hbm %s1413_s1, 512 }
   0x7   :  { %p960_p0 = scmp.ne.s32.totalorder %s1413_s1, %s959_s19  ;;  %p963_p1 = scmp.lt.u32.totalorder %s959_s19, %s1413_s1 }
   0x9   :  { %p965_p2 = pnand %p963_p1, %p960_p0 }
   0xb   :  { %968 = shalt.err (!%p965_p2)
}
   0xc   :  { %s969_s24 = scalar_lea.vmem %s38_s14, 512  ;;  %p974_p4 = scmp.lt.s32.totalorder %s38_s14, %s38_s14 }
   0xd   :  { %p970_p3 = scmp.ne.s32.totalorder %s38_s14, %s969_s24  ;;  %p975_p5 = scmp.lt.s32.totalorder %s969_s24, %s969_s24 }
   0xf   :  { %p976_p6 = por %p975_p5, %p974_p4 }
  0x11   :  { %p977_p7 = pnand %p976_p6, %p970_p3 }
  0x13   :  { %980 = shalt.err (!%p977_p7)
}
  0x14   :  { %s1147_s25 = smov 128   ;;  %s1148_s26 = smov 8  }
  0x15   :  { %43 = dma.hbm_to_vmem [thread:$0]  %s1413_s1, 512, %s38_s14, [#allocation6], %s1147_s25, %s1147_s25, %s1148_s26  }
  0x16   :  { %s981_s11 = scalar_lea.hbm %s1415_s3, 512 }
  0x17   :  { %p982_p8 = scmp.ne.s32.totalorder %s1415_s3, %s981_s11  ;;  %p985_p9 = scmp.lt.u32.totalorder %s981_s11, %s1415_s3 }
  0x19   :  { %p987_p10 = pnand %p985_p9, %p982_p8 }
  0x1b   :  { %990 = shalt.err (!%p987_p10)
}
  0x1c   :  { %s991_s18 = scalar_lea.vmem %s1210_s16, 512  ;;  %p996_p12 = scmp.lt.s32.totalorder %s1210_s16, %s1210_s16 }
  0x1d   :  { %p992_p11 = scmp.ne.s32.totalorder %s1210_s16, %s991_s18  ;;  %p997_p13 = scmp.lt.s32.totalorder %s991_s18, %s991_s18 }
  0x1f   :  { %p998_p0 = por %p997_p13, %p996_p12 }
  0x21   :  { %p999_p1 = pnand %p998_p0, %p992_p11 }
  0x23   :  { %1002 = shalt.err (!%p999_p1)
}
  0x24   :  { %67 = dma.hbm_to_vmem [thread:$0]  %s1415_s3, 512, %s1210_s16, [#allocation9], %s1147_s25, %s1147_s25, %s1148_s26  }
  0x25   :  { %s1149_s19 = smov [#allocation11]   ;;  %s1150_s21 = smov [#allocation2]  }
  0x26   :  { %s85_s20 = sshll.u32 %s1149_s19, 4  ;;  %s25_s22 = sshll.u32 %s1150_s21, 4  ;;  %s86_s20 = int_to_ptr.vmem [resolvable:$true] %s85_s20  ;;  %s1247_s22 = int_to_ptr.vmem [resolvable:$true] %s25_s22 }
  0x27   :  { %s1003_s27 = scalar_lea.hbm %s1417_s5, 512 }
  0x28   :  { %p1004_p2 = scmp.ne.s32.totalorder %s1417_s5, %s1003_s27  ;;  %p1007_p3 = scmp.lt.u32.totalorder %s1003_s27, %s1417_s5 }
  0x2a   :  { %p1009_p4 = pnand %p1007_p3, %p1004_p2 }
  0x2c   :  { %1012 = shalt.err (!%p1009_p4)
}
  0x2d   :  { %s1013_s3 = scalar_lea.vmem %s86_s20, 512  ;;  %p1018_p6 = scmp.lt.s32.totalorder %s86_s20, %s86_s20 }
  0x2e   :  { %p1014_p5 = scmp.ne.s32.totalorder %s86_s20, %s1013_s3  ;;  %p1019_p7 = scmp.lt.s32.totalorder %s1013_s3, %s1013_s3 }
  0x30   :  { %p1020_p8 = por %p1019_p7, %p1018_p6 }
  0x32   :  { %p1021_p9 = pnand %p1020_p8, %p1014_p5 }
  0x34   :  { %1024 = shalt.err (!%p1021_p9)
}
  0x35   :  { %91 = dma.hbm_to_vmem [thread:$0]  %s1417_s5, 512, %s86_s20, [#allocation12], %s1147_s25, %s1147_s25, %s1148_s26  }
  0x36   :  { %s1025_s17 = scalar_lea.hbm %s1412_s0, 512 }
  0x37   :  { %p1026_p10 = scmp.ne.s32.totalorder %s1412_s0, %s1025_s17  ;;  %p1029_p11 = scmp.lt.u32.totalorder %s1025_s17, %s1412_s0 }
  0x39   :  { %p1031_p12 = pnand %p1029_p11, %p1026_p10 }
  0x3b   :  { %1034 = shalt.err (!%p1031_p12)
}
  0x3c   :  { %s1035_s21 = scalar_lea.vmem %s1247_s22, 512  ;;  %p1040_p0 = scmp.lt.s32.totalorder %s1247_s22, %s1247_s22 }
  0x3d   :  { %p1036_p13 = scmp.ne.s32.totalorder %s1247_s22, %s1035_s21  ;;  %p1041_p1 = scmp.lt.s32.totalorder %s1035_s21, %s1035_s21 }
  0x3f   :  { %p1042_p2 = por %p1041_p1, %p1040_p0 }
  0x41   :  { %p1043_p3 = pnand %p1042_p2, %p1036_p13 }
  0x43   :  { %1046 = shalt.err (!%p1043_p3)
}
  0x44   :  { %31 = dma.hbm_to_vmem [thread:$0]  %s1412_s0, 512, %s1247_s22, [#allocation3], %s1147_s25, %s1147_s25, %s1148_s26  }
  0x45   :  { %s1151_s23 = smov [#allocation7]   ;;  %s1152_s27 = smov [#allocation10]  }
  0x46   :  { %s49_s24 = sshll.u32 %s1151_s23, 4  ;;  %s73_s28 = sshll.u32 %s1152_s27, 4  ;;  %s50_s24 = int_to_ptr.vmem [resolvable:$true] %s49_s24  ;;  %s1284_s28 = int_to_ptr.vmem [resolvable:$true] %s73_s28 }
  0x47   :  { %s1047_s11 = scalar_lea.hbm %s1414_s2, 512 }
  0x48   :  { %p1048_p4 = scmp.ne.s32.totalorder %s1414_s2, %s1047_s11  ;;  %p1051_p5 = scmp.lt.u32.totalorder %s1047_s11, %s1414_s2 }
  0x4a   :  { %p1053_p6 = pnand %p1051_p5, %p1048_p4 }
  0x4c   :  { %1056 = shalt.err (!%p1053_p6)
}
  0x4d   :  { %s1057_s0 = scalar_lea.vmem %s50_s24, 512  ;;  %p1062_p8 = scmp.lt.s32.totalorder %s50_s24, %s50_s24 }
  0x4e   :  { %p1058_p7 = scmp.ne.s32.totalorder %s50_s24, %s1057_s0  ;;  %p1063_p9 = scmp.lt.s32.totalorder %s1057_s0, %s1057_s0 }
  0x50   :  { %p1064_p10 = por %p1063_p9, %p1062_p8 }
  0x52   :  { %p1065_p11 = pnand %p1064_p10, %p1058_p7 }
  0x54   :  { %1068 = shalt.err (!%p1065_p11)
}
  0x55   :  { %55 = dma.hbm_to_vmem [thread:$0]  %s1414_s2, 512, %s50_s24, [#allocation6], %s1147_s25, %s1147_s25, %s1148_s26  }
  0x56   :  { %s1069_s1 = scalar_lea.hbm %s1416_s4, 512 }
  0x57   :  { %p1070_p12 = scmp.ne.s32.totalorder %s1416_s4, %s1069_s1  ;;  %p1073_p13 = scmp.lt.u32.totalorder %s1069_s1, %s1416_s4 }
  0x59   :  { %p1075_p0 = pnand %p1073_p13, %p1070_p12 }
  0x5b   :  { %1078 = shalt.err (!%p1075_p0)
}
  0x5c   :  { %s1079_s20 = scalar_lea.vmem %s1284_s28, 512  ;;  %p1084_p2 = scmp.lt.s32.totalorder %s1284_s28, %s1284_s28 }
  0x5d   :  { %p1080_p1 = scmp.ne.s32.totalorder %s1284_s28, %s1079_s20  ;;  %p1085_p3 = scmp.lt.s32.totalorder %s1079_s20, %s1079_s20 }
  0x5f   :  { %p1086_p4 = por %p1085_p3, %p1084_p2 }
  0x61   :  { %p1087_p5 = pnand %p1086_p4, %p1080_p1 }
  0x63   :  { %1090 = shalt.err (!%p1087_p5)
}
  0x64   :  { %79 = dma.hbm_to_vmem [thread:$0]  %s1416_s4, 512, %s1284_s28, [#allocation9], %s1147_s25, %s1147_s25, %s1148_s26  }
  0x65   :  { %s1153_s24 = smov [#allocation13]   ;;  %s1091_s11 = scalar_lea.hbm %s1420_s8, 16 }
  0x66   :  { %s102_s27 = sshll.u32 %s1153_s24, 4  ;;  %p1092_p6 = scmp.ne.s32.totalorder %s1420_s8, %s1091_s11  ;;  %s103_s27 = int_to_ptr.vmem [resolvable:$true] %s102_s27 }
  0x67   :  { %p1095_p7 = scmp.lt.u32.totalorder %s1091_s11, %s1420_s8 }
  0x69   :  { %p1097_p8 = pnand %p1095_p7, %p1092_p6 }
  0x6b   :  { %1100 = shalt.err (!%p1097_p8)
}
  0x6c   :  { %s1101_s0 = scalar_lea.vmem %s103_s27, 16  ;;  %s1105_s4 = scalar_lea.vmem %s103_s27, 32 }
  0x6d   :  { %p1102_p9 = scmp.ne.s32.totalorder %s103_s27, %s1101_s0  ;;  %p1106_p10 = scmp.lt.s32.totalorder %s103_s27, %s103_s27 }
  0x6e   :  { %p1107_p11 = scmp.lt.s32.totalorder %s1105_s4, %s1101_s0 }
  0x70   :  { %p1108_p12 = por %p1107_p11, %p1106_p10 }
  0x72   :  { %p1109_p13 = pnand %p1108_p12, %p1102_p9 }
  0x74   :  { %1112 = shalt.err (!%p1109_p13)
}
  0x75   :  { %105 = dma.hbm_to_vmem [thread:$0]  %s1420_s8, 16, %s103_s27, [#allocation12]  }
  0x76   :  { %1135 = dma.done.wait [#allocation3], 512  }
  0x77   :  { %1136 = vsyncadd [#allocation3], 4294966784 }
  0x78   :  { %1137 = dma.done.wait [#allocation6], 1024  }
  0x79   :  { %1138 = vsyncadd [#allocation6], 4294966272 }
  0x7a   :  { %1139 = dma.done.wait [#allocation9], 1024  }
  0x7b   :  { %1140 = vsyncadd [#allocation9], 4294966272 }
  0x7c   :  { %1141 = dma.done.wait [#allocation12], 528  }
  0x7d   :  { %1142 = vsyncadd [#allocation12], 4294966768  ;;  %vm144_vm0 = vcmask 261120   ;;  %v246_v0 = vld [vmem:[#allocation10] sm:$0xff]  ;;  %v247_v1 = vld [vmem:[#allocation10 + $0x8] sm:$0xff] }
  0x7e   :  { %v248_v2 = vld [vmem:[#allocation10 + $0x10] sm:$0xff]  ;;  %v897_v3 = vpack.c.bf16 %v247_v1, %v246_v0  ;;  %v249_v4 = vld [vmem:[#allocation10 + $0x18] sm:$0xff]  ;;  %v242_v5 = vld [vmem:[#allocation5] sm:$0xff] }
  0x7f   :  { %v901_v6 = vpack.c.bf16 %v249_v4, %v248_v2  ;;  %841 = vmatprep.mubr.msk.f32.mxu1 %vm144_vm0, %v242_v5  ;;  %v133_v7 = vld [vmem:[#allocation8] sm:$0xff]  ;;  %v134_v8 = vld [vmem:[#allocation8 + $0x8] sm:$0xff]  ;;  %v135_v9 = vld [vmem:[#allocation8 + $0x10] sm:$0xff] }
  0x80   :  { %898 = vmatprep.subr.bf16.mxu1 %v897_v3  ;;  %v136_v10 = vld [vmem:[#allocation8 + $0x18] sm:$0xff]  ;;  %v889_v11 = vpack.c.bf16 %v134_v8, %v133_v7  ;;  %v129_v13 = vld [vmem:[#allocation2] sm:$0xff]  ;;  %v243_v14 = vld [vmem:[#allocation5 + $0x8] sm:$0xff] }
  0x81   :  { %900 = vmatpush3.bf16.msra.mxu1 %v897_v3  ;;  %v893_v12 = vpack.c.bf16 %v136_v10, %v135_v9  ;;  %827 = vmatprep.mubr.msk.f32.mxu0 %vm144_vm0, %v129_v13  ;;  %v244_v15 = vld [vmem:[#allocation5 + $0x10] sm:$0xff]  ;;  %v130_v16 = vld [vmem:[#allocation2 + $0x8] sm:$0xff]  ;;  %v245_v17 = vld [vmem:[#allocation5 + $0x18] sm:$0xff] }
  0x82   :  { %902 = vmatprep.subr.bf16.mxu1 %v901_v6  ;;  %890 = vmatprep.subr.bf16.mxu0 %v889_v11  ;;  %v131_v18 = vld [vmem:[#allocation2 + $0x10] sm:$0xff]  ;;  %v132_v19 = vld [vmem:[#allocation2 + $0x18] sm:$0xff]  ;;  %v757_v20 = vld [vmem:[%s1419_s7] ss:$0 sm:$0xff] }
  0x83   :  { %892 = vmatpush3.bf16.msra.mxu0 %v889_v11  ;;  %v752_v25 = vld [vmem:[%s1418_s6] ss:$0 sm:$0xff]  ;;  %vm1349_vm1 = vmpackc.low %vm144_vm0, %vm144_vm0  ;;  %v359_v42 = vld [vmem:[#allocation11 + $0x8] sm:$0xff] }
  0x84   :  { %894 = vmatprep.subr.bf16.mxu0 %v893_v12  ;;  %v358_v41 = vld [vmem:[#allocation11] sm:$0xff]  ;;  %v360_v43 = vld [vmem:[#allocation11 + $0x10] sm:$0xff]  ;;  %v361_v45 = vld [vmem:[#allocation11 + $0x18] sm:$0xff] }
  0x85   :  { %904 = vmatpush3.bf16.msra.mxu1 %v901_v6  ;;  %v905_v44 = vpack.c.bf16 %v359_v42, %v358_v41  ;;  %v354_v46 = vld [vmem:[#allocation7] sm:$0xff]  ;;  %v909_v47 = vpack.c.bf16 %v361_v45, %v360_v43  ;;  %v355_v48 = vld [vmem:[#allocation7 + $0x8] sm:$0xff]  ;;  %v356_v49 = vld [vmem:[#allocation7 + $0x10] sm:$0xff] }
  0x86   :  { %v357_v50 = vld [vmem:[#allocation7 + $0x18] sm:$0xff]  ;;  %v579_v53 = vld [vmem:[%s1421_s9] sm:$0xff]  ;;  %v580_v56 = vld [vmem:[%s1421_s9 + $0x8] sm:$0xff] }
  0x87   :  { %896 = vmatpush3.bf16.msra.mxu0 %v893_v12  ;;  %v581_v60 = vld [vmem:[%s1421_s9 + $0x10] sm:$0xff]  ;;  %v582_v1 = vld [vmem:[%s1421_s9 + $0x18] sm:$0xff]  ;;  %s1154_s9 = smov [#allocation14]  }
  0x88   :  { %842 = vmatmul.mubr.msk.f32.vlgmr.msra.gmra.mrb[0].mxu1 %vm144_vm0, %v243_v14  ;;  %906 = vmatprep.subr.bf16.mxu0 %v905_v44  ;;  %s737_s2 = sshll.u32 %s1154_s9, 4  ;;  %s738_s2 = int_to_ptr.vmem [resolvable:$true] %s737_s2 }
  0x89   :  { %844 = vmatprep.mubr.msk.f32.mxu1 %vm144_vm0, %v244_v15  ;;  %s1113_s23 = scalar_lea.vmem %s738_s2, 512  ;;  %p1118_p1 = scmp.lt.s32.totalorder %s738_s2, %s738_s2 }
  0x8a   :  { %828 = vmatmul.mubr.msk.f32.vlgmr.msra.gmra.mrb[0].mxu0 %vm144_vm0, %v130_v16  ;;  %p1114_p0 = scmp.ne.s32.totalorder %s738_s2, %s1113_s23  ;;  %p1119_p2 = scmp.lt.s32.totalorder %s1113_s23, %s1113_s23 }
  0x8b   :  { %830 = vmatprep.mubr.msk.f32.mxu0 %vm144_vm0, %v131_v18  ;;  %908 = vmatpush3.bf16.msra.mxu0 %v905_v44 }
  0x8c   :  { %845 = vmatmul.mubr.msk.f32.gmra.mrb[2].mxu1 %vm144_vm0, %v245_v17  ;;  %910 = vmatprep.subr.bf16.mxu0 %v909_v47  ;;  %p1120_p3 = por %p1119_p2, %p1118_p1 }
  0x8e   :  { %831 = vmatmul.mubr.msk.f32.gmra.mrb[2].mxu0 %vm144_vm0, %v132_v19  ;;  %p1121_p4 = pnand %p1120_p3, %p1114_p0 }
  0x8f   :  { %855 = vmatprep.mubr.msk.f32.mxu0 %vm144_vm0, %v354_v46  ;;  %912 = vmatpush3.bf16.msra.mxu0 %v909_v47 }
  0x92   :  { %856 = vmatmul.mubr.msk.f32.vlgmr.msra.gmra.mrb[4].mxu0 %vm144_vm0, %v355_v48 }
  0x93   :  { %858 = vmatprep.mubr.msk.f32.mxu0 %vm144_vm0, %v356_v49 }
  0x96   :  { %859 = vmatmul.mubr.msk.f32.gmra.mrb[6].mxu0 %vm144_vm0, %v357_v50 }
 0x15b   :  { %v843_v21 = vpop.f32.mrb[0].mxu1 }
 0x15c   :  { %v341_v22 = vadd.f32 %v843_v21, %v757_v20  ;;  %v335_v23 = vpop.f32.mrb[1].mxu1 }
 0x15d   :  { %v336_v24 = vadd.f32 %v757_v20, %v335_v23  ;;  %v829_v27 = vpop.f32.mrb[0].mxu0 }
 0x15e   :  { %v223_v30 = vpop.f32.mrb[1].mxu0  ;;  %v229_v39 = vadd.f32 %v829_v27, %v752_v25 }
 0x15f   :  { %v913_v28 = vpack.c.bf16 %v341_v22, %v336_v24  ;;  %v846_v29 = vpop.f32.mrb[2].mxu1  ;;  %v224_v33 = vadd.f32 %v752_v25, %v223_v30 }
 0x160   :  { %v351_v31 = vadd.f32 %v846_v29, %v757_v20  ;;  %v345_v32 = vpop.f32.mrb[3].mxu1 }
 0x161   :  { %915 = vmatprep.subr.msk.bf16.mxu1 %vm1349_vm1, %v913_v28  ;;  %v346_v34 = vadd.f32 %v757_v20, %v345_v32  ;;  %v832_v35 = vpop.f32.mrb[2].mxu0  ;;  %869 = vmatprep.mubr.msk.f32.mxu1 %vm144_vm0, %v224_v33 }
 0x162   :  { %918 = vmatpush3.bf16.xpose.msk.msra.mxu1 %vm1349_vm1, %v913_v28  ;;  %v233_v37 = vpop.f32.mrb[3].mxu0  ;;  %v239_v40 = vadd.f32 %v832_v35, %v752_v25  ;;  %v762_v28 = vld [vmem:[#allocation13] ss:$0 sm:$0xff] }
 0x163   :  { %v919_v36 = vpack.c.bf16 %v351_v31, %v346_v34  ;;  %v234_v38 = vadd.f32 %v752_v25, %v233_v37 }
 0x165   :  { %921 = vmatprep.subr.msk.bf16.mxu1 %vm1349_vm1, %v919_v36  ;;  %v857_v27 = vpop.f32.mrb[4].mxu0 }
 0x166   :  { %v453_v29 = vadd.f32 %v857_v27, %v762_v28  ;;  %v447_v30 = vpop.f32.mrb[5].mxu0 }
 0x167   :  { %v448_v31 = vadd.f32 %v762_v28, %v447_v30 }
 0x169   :  { %v925_v32 = vpack.c.bf16 %v453_v29, %v448_v31  ;;  %v860_v33 = vpop.f32.mrb[6].mxu0 }
 0x16a   :  { %924 = vmatpush3.bf16.xpose.msk.msra.mxu1 %vm1349_vm1, %v919_v36  ;;  %v457_v34 = vpop.f32.mrb[7].mxu0  ;;  %v463_v35 = vadd.f32 %v860_v33, %v762_v28 }
 0x16b   :  { %926 = vmatprep.subr.bf16.mxu0 %v925_v32  ;;  %v458_v36 = vadd.f32 %v762_v28, %v457_v34 }
 0x16c   :  { %928 = vmatpush3.bf16.msra.mxu0 %v925_v32 }
 0x16d   :  { %v929_v37 = vpack.c.bf16 %v463_v35, %v458_v36 }
 0x16f   :  { %930 = vmatprep.subr.bf16.mxu0 %v929_v37 }
 0x170   :  { %932 = vmatpush3.bf16.msra.mxu0 %v929_v37 }
 0x171   :  { %870 = vmatmul.mubr.msk.f32.vlgmr.msra.gmra.mrb[4].mxu1 %vm144_vm0, %v229_v39 }
 0x172   :  { %872 = vmatprep.mubr.msk.f32.mxu1 %vm144_vm0, %v234_v38 }
 0x175   :  { %873 = vmatmul.mubr.msk.f32.gmra.mrb[6].mxu1 %vm144_vm0, %v239_v40 }
 0x244   :  { %v871_v51 = vpop.f32.mrb[4].mxu1 }
 0x245   :  { %v556_v52 = vpop.f32.mrb[5].mxu1  ;;  %v576_v54 = vmul.f32 0.17677669, %v871_v51 }
 0x246   :  { %v575_v55 = vmul.f32 0.17677669, %v556_v52 }
 0x247   :  { %v584_v0 = vadd.f32 %v580_v56, %v576_v54 }
 0x248   :  { %v874_v57 = vpop.f32.mrb[6].mxu1  ;;  %v583_v58 = vadd.f32 %v579_v53, %v575_v55 }
 0x249   :  { %v566_v59 = vpop.f32.mrb[7].mxu1  ;;  %v578_v61 = vmul.f32 0.17677669, %v874_v57  ;;  %v590_v3 = vsel %vm144_vm0, %v584_v0, -inf }
 0x24a   :  { %v577_v62 = vmul.f32 0.17677669, %v566_v59  ;;  %v587_v63 = vsel %vm144_vm0, %v583_v58, -inf }
 0x24b   :  { %588 = vmax.xlane.f32.xlu0 %v587_v63  ;;  %v586_v5 = vadd.f32 %v582_v1, %v578_v61 }
 0x24c   :  { %v585_v2 = vadd.f32 %v581_v60, %v577_v62 }
 0x24d   :  { %v596_v6 = vsel %vm144_vm0, %v586_v5, -inf }
 0x24e   :  { %v593_v4 = vsel %vm144_vm0, %v585_v2, -inf }
 0x24f   :  { %591 = vmax.xlane.f32.xlu0 %v590_v3  ;;  %594 = vmax.xlane.f32.xlu1 %v593_v4 }
 0x253   :  { %597 = vmax.xlane.f32.xlu1 %v596_v6 }
 0x2d8   :  { %v589_v7 = vpop.xlane.xlu0 %588 }
 0x2d9   :  { %v599_v8 = vsub.f32 %v583_v58, %v589_v7 }
 0x2db   :  { %v603_v9 = vmul.f32 1.442695, %v599_v8 }
 0x2dc   :  { %v592_v10 = vpop.xlane.xlu0 %591  ;;  %v595_v11 = vpop.xlane.xlu1 %594 }
 0x2dd   :  { %943 = vpow2.f32 %v603_v9  ;;  %v600_v12 = vsub.f32 %v584_v0, %v592_v10  ;;  %v601_v13 = vsub.f32 %v585_v2, %v595_v11 }
 0x2df   :  { %v605_v14 = vmul.f32 1.442695, %v600_v12  ;;  %v607_v15 = vmul.f32 1.442695, %v601_v13 }
 0x2e0   :  { %v598_v16 = vpop.xlane.xlu1 %597 }
 0x2e1   :  { %945 = vpow2.f32 %v605_v14  ;;  %v602_v17 = vsub.f32 %v586_v5, %v598_v16 }
 0x2e2   :  { %947 = vpow2.f32 %v607_v15 }
 0x2e3   :  { %v609_v18 = vmul.f32 1.442695, %v602_v17 }
 0x2e5   :  { %949 = vpow2.f32 %v609_v18 }
 0x2e7   :  { %v944_v19 = vpop.eup %943 }
 0x2e8   :  { %v611_v20 = vsel %vm144_vm0, %v944_v19, 0.0 }
 0x2e9   :  { %612 = vadd.xlane.f32.xlu0 %v611_v20 }
 0x2eb   :  { %v946_v21 = vpop.eup %945 }
 0x2ec   :  { %v948_v22 = vpop.eup %947  ;;  %v614_v23 = vsel %vm144_vm0, %v946_v21, 0.0 }
 0x2ed   :  { %615 = vadd.xlane.f32.xlu1 %v614_v23  ;;  %v617_v24 = vsel %vm144_vm0, %v948_v22, 0.0 }
 0x2ee   :  { %618 = vadd.xlane.f32.xlu0 %v617_v24 }
 0x2ef   :  { %v950_v25 = vpop.eup %949 }
 0x2f0   :  { %v620_v26 = vsel %vm144_vm0, %v950_v25, 0.0 }
 0x2f1   :  { %621 = vadd.xlane.f32.xlu1 %v620_v26 }
 0x376   :  { %v613_v38 = vpop.xlane.xlu0 %612 }
 0x377   :  { %951 = vrcp.f32 %v613_v38 }
 0x37a   :  { %v616_v39 = vpop.xlane.xlu1 %615 }
 0x37b   :  { %v619_v40 = vpop.xlane.xlu0 %618  ;;  %953 = vrcp.f32 %v616_v39 }
 0x37c   :  { %955 = vrcp.f32 %v619_v40 }
 0x37e   :  { %v622_v41 = vpop.xlane.xlu1 %621 }
 0x37f   :  { %957 = vrcp.f32 %v622_v41 }
 0x381   :  { %v952_v42 = vpop.eup %951 }
 0x382   :  { %v624_v43 = vmul.f32 %v952_v42, %v944_v19 }
 0x384   :  { %883 = vmatprep.mubr.msk.f32.mxu0 %vm144_vm0, %v624_v43 }
 0x385   :  { %v954_v44 = vpop.eup %953 }
 0x386   :  { %v956_v45 = vpop.eup %955  ;;  %v626_v46 = vmul.f32 %v954_v44, %v946_v21 }
 0x387   :  { %v628_v47 = vmul.f32 %v956_v45, %v948_v22 }
 0x388   :  { %884 = vmatmul.mubr.msk.f32.vlgmr.msra.gmra.mrb[8].mxu0 %vm144_vm0, %v626_v46 }
 0x389   :  { %v958_v48 = vpop.eup %957  ;;  %886 = vmatprep.mubr.msk.f32.mxu0 %vm144_vm0, %v628_v47 }
 0x38a   :  { %v630_v49 = vmul.f32 %v958_v48, %v950_v25 }
 0x38c   :  { %887 = vmatmul.mubr.msk.f32.gmra.mrb[10].mxu0 %vm144_vm0, %v630_v49 }
 0x45b   :  { %v885_v50 = vpop.f32.mrb[8].mxu0 }
 0x45c   :  { %729 = vst.msk [vmem:[#allocation14 + $0x8] sm:$0xff] %vm144_vm0, %v885_v50  ;;  %v709_v51 = vpop.f32.mrb[9].mxu0 }
 0x45d   :  { %728 = vst.msk [vmem:[#allocation14] sm:$0xff] %vm144_vm0, %v709_v51 }
 0x45f   :  { %v888_v52 = vpop.f32.mrb[10].mxu0 }
 0x460   :  { %731 = vst.msk [vmem:[#allocation14 + $0x18] sm:$0xff] %vm144_vm0, %v888_v52  ;;  %v719_v53 = vpop.f32.mrb[11].mxu0 }
 0x461   :  { %730 = vst.msk [vmem:[#allocation14 + $0x10] sm:$0xff] %vm144_vm0, %v719_v53 }
 0x462   :  { %1124 = shalt.err (!%p1121_p4)
}
 0x463   :  { %s1125_s29 = scalar_lea.hbm %s1422_s10, 512 }
 0x464   :  { %p1126_p5 = scmp.ne.s32.totalorder %s1422_s10, %s1125_s29  ;;  %p1129_p6 = scmp.lt.u32.totalorder %s1125_s29, %s1422_s10 }
 0x466   :  { %p1131_p7 = pnand %p1129_p6, %p1126_p5 }
 0x468   :  { %1134 = shalt.err (!%p1131_p7)
}
 0x469   :  { %743 = dma.vmem_to_hbm [thread:$0]  %s738_s2, 512, %s1422_s10, [#allocation4], %s1147_s25, %s1147_s25, %s1148_s26  }
 0x46a   :  { %1143 = dma.done.wait [#allocation4], 512  }
 0x46b   :  { %1144 = vsyncadd [#allocation4], 4294966784 }
 0x46c   :  { %747 = vsyncpa [#allocation3], 1 }
 0x46d   :  { %748 = vsyncpa [#allocation6], 1 }
 0x46e   :  { %749 = vsyncpa [#allocation9], 1 }
 0x46f   :  { %750 = vsyncpa [#allocation12], 1 }
 0x470   :  { %751 = vsyncpa [#allocation4], 1 }

</bundles_post_ra>
